<compile_context>
chip_gen: v7x
topology: tpu7x:2x2x1
jax: 0.10.0
libtpu: 0.0.40
codegen_flags: <defaults>
</compile_context>

<pallas_src>
import functools

import jax
import jax.numpy as jnp
from jax.experimental import pallas as pl
from jax.experimental.pallas import tpu as pltpu

HIDDEN = 1024      # BART-large hidden size (fixed by nn.Linear(1024, 9))
N_ASPECTS = 9      # number of aspect classes
NP = 128           # lane-padded aspect dim
TL_MAX = 1024      # row tile cap: 2 x (1024 x 1024 x 2B bf16) = 4 MiB double-buffered
SUM_ROWS = 8       # (8, 128)-aligned summary slab emitted per tile


def _round_up(x, m):
    return ((x + m - 1) // m) * m


def _tile(L):
    TL = min(TL_MAX, _round_up(L, 8))
    L_pad = _round_up(L, TL)
    return TL, L_pad, L_pad // TL


def _pad_rows(x, L_pad):
    L = x.shape[0]
    if L_pad != L:
        x = jnp.pad(x, ((0, L_pad - L), (0, 0)))
    return x


def _slab(rows):
    """Pack a list of (1, NP) row vectors into a full (SUM_ROWS, NP) slab
    (unmasked, fully-aligned (8,128) store)."""
    r = jax.lax.broadcasted_iota(jnp.int32, (SUM_ROWS, NP), 0)
    out = jnp.zeros((SUM_ROWS, NP), jnp.float32)
    for k, v in enumerate(rows):
        out = out + jnp.where(r == k, v, 0.0)
    return out


# ----------------------------------------------------------------------------
# Pallas kernels
# ----------------------------------------------------------------------------
def _dec_detector_kernel(last_ref, aspect_ref, x_ref, wt_ref, b_ref, sum_ref,
                         *, L, TL, n_segs, dist_type):
    """Decoder aspect head for one row tile:
         pred = x @ W^T + b                       (MXU, bf16 in / f32 acc)
         label built from SMEM scalars            (segment compares on iota)
         emits row0 = per-column SSE partial, row1 = per-column sum (masked),
               row2 = pred[L-1] selection."""
    i = pl.program_id(0)
    pred = jnp.dot(x_ref[...], wt_ref[...],
                   preferred_element_type=jnp.float32) + b_ref[...]      # (TL, NP) f32

    row_ids = i * TL + jax.lax.broadcasted_iota(jnp.int32, (TL, NP), 0)
    col_ids = jax.lax.broadcasted_iota(jnp.int32, (TL, NP), 1)

    plain = jnp.zeros((TL, NP), jnp.float32)
    cum = jnp.zeros((TL, NP), jnp.float32)
    for s in range(n_segs):                       # n_segs is small and static
        la = last_ref[s]
        p = last_ref[s - 1] if s > 0 else 0
        a = aspect_ref[s]
        seg_len = la - p
        c = 1.0 / seg_len.astype(jnp.float32)
        col_match = col_ids == a
        in_seg = (row_ids > p) & (row_ids <= la)
        plain = plain + jnp.where(col_match & in_seg, c, 0.0)
        if dist_type == 2:
            cnt = jnp.clip(row_ids - p, 0, seg_len).astype(jnp.float32)
            cum = cum + jnp.where(col_match, c * cnt, 0.0)

    if dist_type == 2:
        # closed form of the reference cumulative min(1, prev+cur) scan;
        # rows 0 and L-1 keep the plain (non-cumulative) label.
        keep_plain = (row_ids == 0) | (row_ids == L - 1)
        label = jnp.where(keep_plain, plain, jnp.minimum(1.0, cum))
    else:
        label = plain

    row_mask = (row_ids < L).astype(jnp.float32)            # mask padded rows
    d = (pred - label) * row_mask
    sse_col = jnp.sum(d * d, axis=0, keepdims=True)                      # (1, NP)
    colsum = jnp.sum(pred * row_mask, axis=0, keepdims=True)             # (1, NP)
    last_sel = (row_ids == L - 1).astype(jnp.float32)
    lastrow = jnp.sum(pred * last_sel, axis=0, keepdims=True)            # (1, NP)

    sum_ref[...] = _slab([sse_col, colsum, lastrow])


def _enc_detector_kernel(x_ref, wt_ref, b_ref, sum_ref, *, L, TL):
    """Encoder aspect head (no label, no SSE): matmul + bias, emits
       row0 = per-column sum (masked), row1 = pred[L-1] selection."""
    i = pl.program_id(0)
    pred = jnp.dot(x_ref[...], wt_ref[...],
                   preferred_element_type=jnp.float32) + b_ref[...]
    row_ids = i * TL + jax.lax.broadcasted_iota(jnp.int32, (TL, NP), 0)
    row_mask = (row_ids < L).astype(jnp.float32)
    colsum = jnp.sum(pred * row_mask, axis=0, keepdims=True)
    last_sel = (row_ids == L - 1).astype(jnp.float32)
    lastrow = jnp.sum(pred * last_sel, axis=0, keepdims=True)
    sum_ref[...] = _slab([colsum, lastrow])


# ----------------------------------------------------------------------------
# Wrappers around pallas_call
# ----------------------------------------------------------------------------
def decoder_head(x, wt_pad, b_pad, last_pos, aspect_ids, dist_type):
    """x: (L, HIDDEN) bf16/f32, wt_pad: (HIDDEN, NP) bf16, b_pad: (1, NP) f32.
    Returns (sse over the 9 real columns, mean-over-rows (1,9), last row (1,9))."""
    L = x.shape[0]
    TL, L_pad, num_tiles = _tile(L)
    x = _pad_rows(x, L_pad)
    n_segs = int(last_pos.shape[0])
    kernel = functools.partial(_dec_detector_kernel, L=L, TL=TL,
                               n_segs=n_segs, dist_type=int(dist_type))
    summary = pl.pallas_call(
        kernel,
        grid_spec=pltpu.PrefetchScalarGridSpec(
            num_scalar_prefetch=2,
            grid=(num_tiles,),
            in_specs=[
                pl.BlockSpec((TL, HIDDEN), lambda i, last, asp: (i, 0)),
                pl.BlockSpec((HIDDEN, NP), lambda i, last, asp: (0, 0)),
                pl.BlockSpec((1, NP), lambda i, last, asp: (0, 0)),
            ],
            out_specs=pl.BlockSpec((SUM_ROWS, NP),
                                   lambda i, last, asp: (i, 0)),
        ),
        out_shape=jax.ShapeDtypeStruct((num_tiles * SUM_ROWS, NP), jnp.float32),
        compiler_params=pltpu.CompilerParams(
            dimension_semantics=("parallel",)),
    )(last_pos.astype(jnp.int32), aspect_ids.astype(jnp.int32), x, wt_pad, b_pad)

    summary = summary.reshape(num_tiles, SUM_ROWS, NP)
    sse = jnp.sum(summary[:, 0, :N_ASPECTS])
    mean_row = jnp.sum(summary[:, 1, :N_ASPECTS], axis=0, keepdims=True) / L
    last_row = jnp.sum(summary[:, 2, :N_ASPECTS], axis=0, keepdims=True)
    return sse, mean_row, last_row


def encoder_head(x, wt_pad, b_pad):
    """Returns (mean-over-rows (1,9), last row (1,9)) of the encoder head."""
    L = x.shape[0]
    TL, L_pad, num_tiles = _tile(L)
    x = _pad_rows(x, L_pad)
    kernel = functools.partial(_enc_detector_kernel, L=L, TL=TL)
    summary = pl.pallas_call(
        kernel,
        grid=(num_tiles,),
        in_specs=[
            pl.BlockSpec((TL, HIDDEN), lambda i: (i, 0)),
            pl.BlockSpec((HIDDEN, NP), lambda i: (0, 0)),
            pl.BlockSpec((1, NP), lambda i: (0, 0)),
        ],
        out_specs=pl.BlockSpec((SUM_ROWS, NP), lambda i: (i, 0)),
        out_shape=jax.ShapeDtypeStruct((num_tiles * SUM_ROWS, NP), jnp.float32),
        compiler_params=pltpu.CompilerParams(
            dimension_semantics=("parallel",)),
    )(x, wt_pad, b_pad)

    summary = summary.reshape(num_tiles, SUM_ROWS, NP)
    mean_row = jnp.sum(summary[:, 0, :N_ASPECTS], axis=0, keepdims=True) / L
    last_row = jnp.sum(summary[:, 1, :N_ASPECTS], axis=0, keepdims=True)
    return mean_row, last_row


# ----------------------------------------------------------------------------
# Forward pass of aspect_summarizaiton_model (minus the BART internals)
# ----------------------------------------------------------------------------
def forward(params, bart_loss, dec_hidden, enc_hidden,
            encoder_aspect_id, decoder_aspect_last_pos, decoder_aspect_id,
            aspect_weight, use_distribution_type, detector_num, use_consist_loss):
    L_dec = dec_hidden.shape[0]
    assert decoder_aspect_last_pos.shape[0] == decoder_aspect_id.shape[1]

    # decoder aspect head: fused matmul + in-kernel label + SSE + summaries
    dec_sse, dec_mean, dec_last = decoder_head(
        dec_hidden, params["dec_wt"], params["dec_b"],
        decoder_aspect_last_pos, decoder_aspect_id[0], use_distribution_type)
    loss = bart_loss + aspect_weight * dec_sse / (L_dec * N_ASPECTS)

    encoder_aspect = None
    if detector_num == 2:
        enc_mean, enc_last = encoder_head(
            enc_hidden, params["enc_wt"], params["enc_b"])
        enc_label = jnp.zeros((1, N_ASPECTS), jnp.float32).at[
            0, encoder_aspect_id[0]].set(1.0)
        if use_distribution_type == 1:
            encoder_aspect = enc_mean
            loss = loss + aspect_weight * jnp.mean((encoder_aspect - enc_label) ** 2)
        elif use_distribution_type == 2:
            encoder_aspect = enc_last
            loss = loss + aspect_weight * jnp.mean((encoder_aspect - enc_label) ** 2)

    if use_consist_loss == 1:
        # TODO(synk): full-pred consistency path (use_distribution_type not in
        # {1, 2}) is not emitted; the kernel only outputs fused mean/last summaries.
        if use_distribution_type == 1:
            dec_a = dec_mean
        elif use_distribution_type == 2:
            dec_a = dec_last
        else:
            dec_a = None
        loss = loss + aspect_weight * jnp.mean((encoder_aspect - dec_a) ** 2)

    return loss


# ----------------------------------------------------------------------------
# Deterministic parameter init (nn.Linear(1024, 9) x 2), pre-padded lane-dense
# ----------------------------------------------------------------------------
def init_params(key):
    k1, k2, k3, k4 = jax.random.split(key, 4)
    scale = 1.0 / jnp.sqrt(HIDDEN)
    dec_w = jax.random.uniform(k1, (N_ASPECTS, HIDDEN), jnp.float32, -scale, scale)
    dec_b = jax.random.uniform(k2, (N_ASPECTS,), jnp.float32, -scale, scale)
    enc_w = jax.random.uniform(k3, (N_ASPECTS, HIDDEN), jnp.float32, -scale, scale)
    enc_b = jax.random.uniform(k4, (N_ASPECTS,), jnp.float32, -scale, scale)
    # pad & pre-transpose into lane-dense layout; weights in bf16 for the MXU
    dec_wt = jnp.zeros((HIDDEN, NP), jnp.float32).at[:, :N_ASPECTS].set(dec_w.T)
    enc_wt = jnp.zeros((HIDDEN, NP), jnp.float32).at[:, :N_ASPECTS].set(enc_w.T)
    dec_bp = jnp.zeros((1, NP), jnp.float32).at[0, :N_ASPECTS].set(dec_b)
    enc_bp = jnp.zeros((1, NP), jnp.float32).at[0, :N_ASPECTS].set(enc_b)
    return {"dec_wt": dec_wt.astype(jnp.bfloat16), "dec_b": dec_bp,
            "enc_wt": enc_wt.astype(jnp.bfloat16), "enc_b": enc_bp}


if __name__ == "__main__":
    key = jax.random.PRNGKey(0)
    kp, kd, ke = jax.random.split(key, 3)
    params = init_params(kp)

    L_DEC, L_ENC = 16, 16
    # hidden states accepted in bf16 (halves the dominant HBM read of x)
    dec_hidden = jax.random.normal(kd, (L_DEC, HIDDEN), jnp.float32).astype(jnp.bfloat16)
    enc_hidden = jax.random.normal(ke, (L_ENC, HIDDEN), jnp.float32).astype(jnp.bfloat16)

    # synthetic BART LM loss (see TODO(synk) above)
    bart_loss = jnp.float32(2.0)

    decoder_aspect_last_pos = jnp.array([4, 9, 14], dtype=jnp.int32)
    decoder_aspect_id = jnp.array([[2, 5, 7]], dtype=jnp.int32)
    encoder_aspect_id = jnp.array([[1, 3]], dtype=jnp.int32)
    aspect_weight = 0.5
    use_distribution_type = 1
    detector_num = 2
    use_consist_loss = 1

    loss = forward(params, bart_loss, dec_hidden, enc_hidden,
                   encoder_aspect_id, decoder_aspect_last_pos, decoder_aspect_id,
                   aspect_weight, use_distribution_type, detector_num,
                   use_consist_loss)
    jax.block_until_ready(loss)
    print("KERNEL_OK")
</pallas_src>

<mosaic_0001>
module attributes {stable_mosaic.version = 11 : i64} {
  func.func @_dec_detector_kernel(%arg0: i32, %arg1: memref<3xi32, #tpu.memory_space<smem>>, %arg2: memref<3xi32, #tpu.memory_space<smem>>, %arg3: memref<16x1024xbf16, #tpu.memory_space<vmem>>, %arg4: memref<1024x128xbf16, #tpu.memory_space<vmem>>, %arg5: memref<1x128xf32, #tpu.memory_space<vmem>>, %arg6: memref<8x128xf32, #tpu.memory_space<vmem>>) attributes {dimension_semantics = [#tpu.dimension_semantics<parallel>], iteration_bounds = array<i64: 1>, scalar_prefetch = 2 : i64, scratch_operands = 0 : i64, tpu.core_type = #tpu.core_type<tc>, window_params = [{transform_indices = @transform_0, window_bounds = array<i64: 16, 1024>}, {pipeline_mode = #tpu.pipeline_mode<synchronous>, transform_indices = @transform_1, window_bounds = array<i64: 1024, 128>}, {pipeline_mode = #tpu.pipeline_mode<synchronous>, transform_indices = @transform_2, window_bounds = array<i64: 1, 128>}, {transform_indices = @transform_3, window_bounds = array<i64: 8, 128>}]} {
    %c0 = arith.constant 0 : index
    %c0_0 = arith.constant 0 : index
    %0 = vector.load %arg3[%c0, %c0_0] : memref<16x1024xbf16, #tpu.memory_space<vmem>>, vector<16x1024xbf16>
    %c0_1 = arith.constant 0 : index
    %c0_2 = arith.constant 0 : index
    %1 = vector.load %arg4[%c0_1, %c0_2] : memref<1024x128xbf16, #tpu.memory_space<vmem>>, vector<1024x128xbf16>
    %cst = arith.constant dense<0.000000e+00> : vector<16x128xf32>
    %2 = tpu.matmul %0, %1, %cst {dimension_numbers = #tpu.dot_dimension_numbers<[1], [0], [0], [1], [0, 0, 1, 1], [], []>} : vector<16x1024xbf16>, vector<1024x128xbf16>, vector<16x128xf32> -> vector<16x128xf32>
    %c0_3 = arith.constant 0 : index
    %c0_4 = arith.constant 0 : index
    %3 = vector.load %arg5[%c0_3, %c0_4] : memref<1x128xf32, #tpu.memory_space<vmem>>, vector<1x128xf32>
    %4 = vector.broadcast %3 : vector<1x128xf32> to vector<16x128xf32>
    %5 = arith.addf %2, %4 : vector<16x128xf32>
    %c16_i32 = arith.constant 16 : i32
    %6 = arith.muli %arg0, %c16_i32 : i32
    %7 = tpu.iota {dimensions = array<i32: 0>} : vector<16x128xi32>
    %8 = vector.broadcast %6 : i32 to vector<16x128xi32>
    %9 = arith.addi %8, %7 : vector<16x128xi32>
    %10 = tpu.iota {dimensions = array<i32: 1>} : vector<16x128xi32>
    %cst_5 = arith.constant 0.000000e+00 : f32
    %11 = vector.broadcast %cst_5 : f32 to vector<16x128xf32>
    %c0_6 = arith.constant 0 : index
    %12 = memref.load %arg1[%c0_6] : memref<3xi32, #tpu.memory_space<smem>>
    %c0_7 = arith.constant 0 : index
    %13 = memref.load %arg2[%c0_7] : memref<3xi32, #tpu.memory_space<smem>>
    %c0_i32 = arith.constant 0 : i32
    %14 = arith.subi %12, %c0_i32 : i32
    %15 = arith.sitofp %14 : i32 to f32
    %cst_8 = arith.constant 1.000000e+00 : f32
    %16 = arith.divf %cst_8, %15 : f32
    %17 = vector.broadcast %13 : i32 to vector<16x128xi32>
    %18 = arith.cmpi eq, %10, %17 : vector<16x128xi32>
    %c0_i32_9 = arith.constant 0 : i32
    %19 = vector.broadcast %c0_i32_9 : i32 to vector<16x128xi32>
    %20 = arith.cmpi sgt, %9, %19 : vector<16x128xi32>
    %21 = vector.broadcast %12 : i32 to vector<16x128xi32>
    %22 = arith.cmpi sle, %9, %21 : vector<16x128xi32>
    %23 = arith.andi %20, %22 : vector<16x128xi1>
    %24 = arith.andi %18, %23 : vector<16x128xi1>
    %cst_10 = arith.constant 0.000000e+00 : f32
    %25 = vector.broadcast %16 : f32 to vector<16x128xf32>
    %26 = vector.broadcast %cst_10 : f32 to vector<16x128xf32>
    %27 = arith.select %24, %25, %26 : vector<16x128xi1>, vector<16x128xf32>
    %28 = arith.addf %11, %27 : vector<16x128xf32>
    %c1 = arith.constant 1 : index
    %29 = memref.load %arg1[%c1] : memref<3xi32, #tpu.memory_space<smem>>
    %c0_11 = arith.constant 0 : index
    %30 = memref.load %arg1[%c0_11] : memref<3xi32, #tpu.memory_space<smem>>
    %c1_12 = arith.constant 1 : index
    %31 = memref.load %arg2[%c1_12] : memref<3xi32, #tpu.memory_space<smem>>
    %32 = arith.subi %29, %30 : i32
    %33 = arith.sitofp %32 : i32 to f32
    %cst_13 = arith.constant 1.000000e+00 : f32
    %34 = arith.divf %cst_13, %33 : f32
    %35 = vector.broadcast %31 : i32 to vector<16x128xi32>
    %36 = arith.cmpi eq, %10, %35 : vector<16x128xi32>
    %37 = vector.broadcast %30 : i32 to vector<16x128xi32>
    %38 = arith.cmpi sgt, %9, %37 : vector<16x128xi32>
    %39 = vector.broadcast %29 : i32 to vector<16x128xi32>
    %40 = arith.cmpi sle, %9, %39 : vector<16x128xi32>
    %41 = arith.andi %38, %40 : vector<16x128xi1>
    %42 = arith.andi %36, %41 : vector<16x128xi1>
    %cst_14 = arith.constant 0.000000e+00 : f32
    %43 = vector.broadcast %34 : f32 to vector<16x128xf32>
    %44 = vector.broadcast %cst_14 : f32 to vector<16x128xf32>
    %45 = arith.select %42, %43, %44 : vector<16x128xi1>, vector<16x128xf32>
    %46 = arith.addf %28, %45 : vector<16x128xf32>
    %c2 = arith.constant 2 : index
    %47 = memref.load %arg1[%c2] : memref<3xi32, #tpu.memory_space<smem>>
    %c1_15 = arith.constant 1 : index
    %48 = memref.load %arg1[%c1_15] : memref<3xi32, #tpu.memory_space<smem>>
    %c2_16 = arith.constant 2 : index
    %49 = memref.load %arg2[%c2_16] : memref<3xi32, #tpu.memory_space<smem>>
    %50 = arith.subi %47, %48 : i32
    %51 = arith.sitofp %50 : i32 to f32
    %cst_17 = arith.constant 1.000000e+00 : f32
    %52 = arith.divf %cst_17, %51 : f32
    %53 = vector.broadcast %49 : i32 to vector<16x128xi32>
    %54 = arith.cmpi eq, %10, %53 : vector<16x128xi32>
    %55 = vector.broadcast %48 : i32 to vector<16x128xi32>
    %56 = arith.cmpi sgt, %9, %55 : vector<16x128xi32>
    %57 = vector.broadcast %47 : i32 to vector<16x128xi32>
    %58 = arith.cmpi sle, %9, %57 : vector<16x128xi32>
    %59 = arith.andi %56, %58 : vector<16x128xi1>
    %60 = arith.andi %54, %59 : vector<16x128xi1>
    %cst_18 = arith.constant 0.000000e+00 : f32
    %61 = vector.broadcast %52 : f32 to vector<16x128xf32>
    %62 = vector.broadcast %cst_18 : f32 to vector<16x128xf32>
    %63 = arith.select %60, %61, %62 : vector<16x128xi1>, vector<16x128xf32>
    %64 = arith.addf %46, %63 : vector<16x128xf32>
    %c16_i32_19 = arith.constant 16 : i32
    %65 = vector.broadcast %c16_i32_19 : i32 to vector<16x128xi32>
    %66 = arith.cmpi slt, %9, %65 : vector<16x128xi32>
    %67 = arith.extui %66 : vector<16x128xi1> to vector<16x128xi32>
    %68 = arith.sitofp %67 : vector<16x128xi32> to vector<16x128xf32>
    %69 = arith.subf %5, %64 : vector<16x128xf32>
    %70 = arith.mulf %69, %68 : vector<16x128xf32>
    %71 = arith.mulf %70, %70 : vector<16x128xf32>
    %cst_20 = arith.constant dense<0.000000e+00> : vector<128xf32>
    %72 = vector.multi_reduction <add>, %71, %cst_20 [0] : vector<16x128xf32> to vector<128xf32>
    %73 = vector.shape_cast %72 : vector<128xf32> to vector<1x128xf32>
    %74 = arith.mulf %5, %68 : vector<16x128xf32>
    %cst_21 = arith.constant dense<0.000000e+00> : vector<128xf32>
    %75 = vector.multi_reduction <add>, %74, %cst_21 [0] : vector<16x128xf32> to vector<128xf32>
    %76 = vector.shape_cast %75 : vector<128xf32> to vector<1x128xf32>
    %c15_i32 = arith.constant 15 : i32
    %77 = vector.broadcast %c15_i32 : i32 to vector<16x128xi32>
    %78 = arith.cmpi eq, %9, %77 : vector<16x128xi32>
    %79 = arith.extui %78 : vector<16x128xi1> to vector<16x128xi32>
    %80 = arith.sitofp %79 : vector<16x128xi32> to vector<16x128xf32>
    %81 = arith.mulf %5, %80 : vector<16x128xf32>
    %cst_22 = arith.constant dense<0.000000e+00> : vector<128xf32>
    %82 = vector.multi_reduction <add>, %81, %cst_22 [0] : vector<16x128xf32> to vector<128xf32>
    %83 = vector.shape_cast %82 : vector<128xf32> to vector<1x128xf32>
    %84 = tpu.iota {dimensions = array<i32: 0>} : vector<8x128xi32>
    %cst_23 = arith.constant 0.000000e+00 : f32
    %85 = vector.broadcast %cst_23 : f32 to vector<8x128xf32>
    %c0_i32_24 = arith.constant 0 : i32
    %86 = vector.broadcast %c0_i32_24 : i32 to vector<8x128xi32>
    %87 = arith.cmpi eq, %84, %86 : vector<8x128xi32>
    %cst_25 = arith.constant 0.000000e+00 : f32
    %88 = vector.shape_cast %73 : vector<1x128xf32> to vector<1x128xf32>
    %89 = vector.broadcast %88 : vector<1x128xf32> to vector<8x128xf32>
    %90 = vector.broadcast %cst_25 : f32 to vector<8x128xf32>
    %91 = arith.select %87, %89, %90 : vector<8x128xi1>, vector<8x128xf32>
    %92 = arith.addf %85, %91 : vector<8x128xf32>
    %c1_i32 = arith.constant 1 : i32
    %93 = vector.broadcast %c1_i32 : i32 to vector<8x128xi32>
    %94 = arith.cmpi eq, %84, %93 : vector<8x128xi32>
    %cst_26 = arith.constant 0.000000e+00 : f32
    %95 = vector.shape_cast %76 : vector<1x128xf32> to vector<1x128xf32>
    %96 = vector.broadcast %95 : vector<1x128xf32> to vector<8x128xf32>
    %97 = vector.broadcast %cst_26 : f32 to vector<8x128xf32>
    %98 = arith.select %94, %96, %97 : vector<8x128xi1>, vector<8x128xf32>
    %99 = arith.addf %92, %98 : vector<8x128xf32>
    %c2_i32 = arith.constant 2 : i32
    %100 = vector.broadcast %c2_i32 : i32 to vector<8x128xi32>
    %101 = arith.cmpi eq, %84, %100 : vector<8x128xi32>
    %cst_27 = arith.constant 0.000000e+00 : f32
    %102 = vector.shape_cast %83 : vector<1x128xf32> to vector<1x128xf32>
    %103 = vector.broadcast %102 : vector<1x128xf32> to vector<8x128xf32>
    %104 = vector.broadcast %cst_27 : f32 to vector<8x128xf32>
    %105 = arith.select %101, %103, %104 : vector<8x128xi1>, vector<8x128xf32>
    %106 = arith.addf %99, %105 : vector<8x128xf32>
    %c0_28 = arith.constant 0 : index
    %c0_29 = arith.constant 0 : index
    %107 = vector.load %arg6[%c0_28, %c0_29] : memref<8x128xf32, #tpu.memory_space<vmem>>, vector<8x128xf32>
    tpu.vector_store %arg6[%c0_28, %c0_29], %106 {strides = array<i32>} : memref<8x128xf32, #tpu.memory_space<vmem>>, vector<8x128xf32>,
    return
  }
  func.func @transform_0(%arg0: i32, %arg1: memref<3xi32, #tpu.memory_space<smem>>, %arg2: memref<3xi32, #tpu.memory_space<smem>>) -> (i32, i32) {
    %c0_i32 = arith.constant 0 : i32
    %c0_i32_0 = arith.constant 0 : i32
    return %arg0, %c0_i32 : i32, i32
  }
  func.func @transform_1(%arg0: i32, %arg1: memref<3xi32, #tpu.memory_space<smem>>, %arg2: memref<3xi32, #tpu.memory_space<smem>>) -> (i32, i32) {
    %c0_i32 = arith.constant 0 : i32
    %c0_i32_0 = arith.constant 0 : i32
    %c0_i32_1 = arith.constant 0 : i32
    return %c0_i32, %c0_i32_0 : i32, i32
  }
  func.func @transform_2(%arg0: i32, %arg1: memref<3xi32, #tpu.memory_space<smem>>, %arg2: memref<3xi32, #tpu.memory_space<smem>>) -> (i32, i32) {
    %c0_i32 = arith.constant 0 : i32
    %c0_i32_0 = arith.constant 0 : i32
    %c0_i32_1 = arith.constant 0 : i32
    return %c0_i32, %c0_i32_0 : i32, i32
  }
  func.func @transform_3(%arg0: i32, %arg1: memref<3xi32, #tpu.memory_space<smem>>, %arg2: memref<3xi32, #tpu.memory_space<smem>>) -> (i32, i32) {
    %c0_i32 = arith.constant 0 : i32
    %c0_i32_0 = arith.constant 0 : i32
    return %arg0, %c0_i32 : i32, i32
  }
}

</mosaic_0001>

<bundles_post_ra>
// kernel: tpu_custom_call.1
= control target key start
LH: loop header
LB: loop body
LE: loop exit
PB: predicated region body
PF: predicated region fallthrough
CT: control target
= control target key end

     0   :  { %s1464_s0 = inlined_call_operand.hbm [shape: s32[3], index: 0, kind: input, shape index: {}]   ;;  %s1465_s2 = inlined_call_operand.hbm [shape: bf16[16,1024], index: 2, kind: input, shape index: {}]   ;;  %s1466_s3 = inlined_call_operand.hbm [shape: bf16[1024,128], index: 3, kind: input, shape index: {}]   ;;  %s1467_s4 = inlined_call_operand.vmem [shape: f32[1,128], index: 4, kind: input, shape index: {}]   ;;  %s1468_s5 = inlined_call_operand.hbm [shape: f32[8,128], index: 5, kind: output, shape index: {}]   ;;  %s1469_s1 = inlined_call_operand.vmem [shape: s32[3], index: 1, kind: input, shape index: {}]  }
   0x1   :  { %s1183_s20 = scalar_lea.hbm %s1464_s0, 16 }
   0x2   :  { %p1184_p0 = scmp.ne.s32.totalorder %s1464_s0, %s1183_s20  ;;  %p1187_p1 = scmp.lt.u32.totalorder %s1183_s20, %s1464_s0 }
   0x4   :  { %p1189_p2 = pnand %p1187_p1, %p1184_p0 }
   0x6   :  { %1192 = shalt.err (!%p1189_p2)  }
   0x7   :  { %s1279_s25 = smov [#allocation3]   ;;  %s12_s30 = sshll.u32 %s1469_s1, 4  ;;  %s13_s30 = int_to_ptr.vmem [resolvable:$true] %s12_s30 }
   0x8   :  { %11 = dma.hbm_to_smem %s1464_s0, 16, %s1279_s25, [#allocation2] }
   0x9   :  { %s1193_s6 = scalar_lea.vmem %s13_s30, 16  ;;  %p1198_p4 = scmp.lt.s32.totalorder %s13_s30, %s13_s30 }
   0xa   :  { %p1194_p3 = scmp.ne.s32.totalorder %s13_s30, %s1193_s6  ;;  %p1199_p5 = scmp.lt.s32.totalorder %s1193_s6, %s1193_s6 }
   0xc   :  { %p1200_p6 = por %p1199_p5, %p1198_p4 }
   0xe   :  { %p1201_p7 = pnand %p1200_p6, %p1194_p3 }
  0x10   :  { %1204 = shalt.err (!%p1201_p7)  }
  0x11   :  { %s1280_s7 = smov [#allocation4]  }
  0x12   :  { %15 = dma.vmem_to_smem %s13_s30, 16, %s1280_s7, [#allocation2] }
  0x13   :  { %1271 = dma.done.wait [#allocation2], 32 }
  0x14   :  { %1272 = vsyncadd [#allocation2], 4294967264 }
  0x15   :  { %17 = sfence }
  0x16   :  { %18 = vsyncpa [#allocation6], 0 }
  0x17   :  { %19 = vsyncpa [#allocation9], 0 }
  0x18   :  { %20 = vsyncpa [#allocation7], 0  ;;  %s1281_s0 = smov [#allocation5]   ;;  %s1205_s10 = scalar_lea.hbm %s1465_s2, 1024 }
  0x19   :  { %s26_s8 = sshll.u32 %s1281_s0, 4  ;;  %p1206_p8 = scmp.ne.s32.totalorder %s1465_s2, %s1205_s10  ;;  %s27_s8 = int_to_ptr.vmem [resolvable:$true] %s26_s8 }
  0x1a   :  { %p1209_p9 = scmp.lt.u32.totalorder %s1205_s10, %s1465_s2 }
  0x1c   :  { %p1211_p10 = pnand %p1209_p9, %p1206_p8 }
  0x1e   :  { %1214 = shalt.err (!%p1211_p10)
}
  0x1f   :  { %s1215_s15 = scalar_lea.vmem %s27_s8, 1024  ;;  %p1220_p12 = scmp.lt.s32.totalorder %s27_s8, %s27_s8 }
  0x20   :  { %p1216_p11 = scmp.ne.s32.totalorder %s27_s8, %s1215_s15  ;;  %p1221_p13 = scmp.lt.s32.totalorder %s1215_s15, %s1215_s15 }
  0x22   :  { %p1222_p0 = por %p1221_p13, %p1220_p12 }
  0x24   :  { %p1223_p1 = pnand %p1222_p0, %p1216_p11 }
  0x26   :  { %1226 = shalt.err (!%p1223_p1)
}
  0x27   :  { %s1282_s16 = smov 512   ;;  %s1283_s17 = smov 32  }
  0x28   :  { %32 = dma.hbm_to_vmem [thread:$0]  %s1465_s2, 1024, %s27_s8, [#allocation6], %s1282_s16, %s1282_s16, %s1283_s17  }
  0x29   :  { %s1284_s20 = smov [#allocation8]   ;;  %s1227_s24 = scalar_lea.hbm %s1466_s3, 8192 }
  0x2a   :  { %s38_s21 = sshll.u32 %s1284_s20, 4  ;;  %p1228_p2 = scmp.ne.s32.totalorder %s1466_s3, %s1227_s24  ;;  %s39_s21 = int_to_ptr.vmem [resolvable:$true] %s38_s21 }
  0x2b   :  { %p1231_p3 = scmp.lt.u32.totalorder %s1227_s24, %s1466_s3 }
  0x2d   :  { %p1233_p4 = pnand %p1231_p3, %p1228_p2 }
  0x2f   :  { %1236 = shalt.err (!%p1233_p4)
}
  0x30   :  { %s1237_s29 = scalar_lea.vmem %s39_s21, 8192  ;;  %p1242_p6 = scmp.lt.s32.totalorder %s39_s21, %s39_s21 }
  0x31   :  { %p1238_p5 = scmp.ne.s32.totalorder %s39_s21, %s1237_s29  ;;  %p1243_p7 = scmp.lt.s32.totalorder %s1237_s29, %s1237_s29 }
  0x33   :  { %p1244_p8 = por %p1243_p7, %p1242_p6 }
  0x35   :  { %p1245_p9 = pnand %p1244_p8, %p1238_p5 }
  0x37   :  { %1248 = shalt.err (!%p1245_p9)
}
  0x38   :  { %s1285_s2 = smov 64   ;;  %s1286_s30 = smov 4  }
  0x39   :  { %44 = dma.hbm_to_vmem [thread:$0]  %s1466_s3, 8192, %s39_s21, [#allocation9], %s1285_s2, %s1285_s2, %s1286_s30  }
  0x3a   :  { %1273 = dma.done.wait [#allocation6], 1024  }
  0x3b   :  { %1274 = vsyncadd [#allocation6], 4294966272 }
  0x3c   :  { %1275 = dma.done.wait [#allocation9], 8192  }
  0x3d   :  { %1276 = vsyncadd [#allocation9], 4294959104  ;;  %s1358_s0 = sld [smem:[#allocation3]]  ;;  %s1360_s8 = sld [smem:[#allocation3 + $0x1]]  ;;  %v1113_v0 = vld [vmem:[#allocation8 + $0x40] sm:$0xff]   ;;  %v1117_v6 = vld [vmem:[#allocation8 + $0x48] sm:$0xff]  }
  0x3e   :  { %s1362_s1 = sld [smem:[#allocation3 + $0x2]]  ;;  %v1114_v1 = vld [vmem:[#allocation8 + $0xc0] sm:$0xff]   ;;  %1009 = vmatprep.subr.bf16.mxu0 %v1113_v0  ;;  %v1118_v8 = vld [vmem:[#allocation8 + $0xc8] sm:$0xff]   ;;  %v1121_v11 = vld [vmem:[#allocation8 + $0x50] sm:$0xff]   ;;  %s1005_s15 = sld [smem:[#allocation4 + $0x1]] }
  0x3f   :  { %v1115_v2 = vld [vmem:[#allocation8] sm:$0xff]   ;;  %1031 = vmatprep.subr.bf16.mxu1 %v1114_v1  ;;  %v1119_v9 = vld [vmem:[#allocation8 + $0x8] sm:$0xff]   ;;  %v1122_v12 = vld [vmem:[#allocation8 + $0xd0] sm:$0xff]   ;;  %s1007_s16 = sld [smem:[#allocation4 + $0x2]]  ;;  %s1288_s20 = smov [#allocation10]  }
  0x40   :  { %v1116_v4 = vld [vmem:[#allocation8 + $0x80] sm:$0xff]   ;;  %1010 = vmatpush3.bf16.msra.mxu0 %v1115_v2  ;;  %v1120_v10 = vld [vmem:[#allocation8 + $0x88] sm:$0xff]   ;;  %v1123_v13 = vld [vmem:[#allocation8 + $0x10] sm:$0xff]   ;;  %s921_s21 = sshll.u32 %s1288_s20, 4  ;;  %s922_s21 = int_to_ptr.vmem [resolvable:$true] %s921_s21 }
  0x41   :  { %1032 = vmatpush3.bf16.msra.mxu1 %v1116_v4  ;;  %1011 = vmatprep.subr.bf16.mxu0 %v1117_v6  ;;  %v1124_v14 = vld [vmem:[#allocation8 + $0x90] sm:$0xff]   ;;  %v1125_v15 = vld [vmem:[#allocation8 + $0x58] sm:$0xff]   ;;  %v1129_v22 = vld [vmem:[#allocation8 + $0x60] sm:$0xff]   ;;  %s1249_s22 = scalar_lea.vmem %s922_s21, 128  ;;  %p1254_p11 = scmp.lt.s32.totalorder %s922_s21, %s922_s21 }
  0x42   :  { %1033 = vmatprep.subr.bf16.mxu1 %v1118_v8  ;;  %v1126_v17 = vld [vmem:[#allocation8 + $0xd8] sm:$0xff]   ;;  %v1130_v23 = vld [vmem:[#allocation8 + $0xe0] sm:$0xff]   ;;  %v1133_v26 = vld [vmem:[#allocation8 + $0x68] sm:$0xff]   ;;  %p1250_p10 = scmp.ne.s32.totalorder %s922_s21, %s1249_s22  ;;  %p1255_p12 = scmp.lt.s32.totalorder %s1249_s22, %s1249_s22 }
  0x43   :  { %s796_s9 = scvt.s32.f32 %s1358_s0  ;;  %s818_s10 = ssub.s32 %s1360_s8, %s1358_s0  ;;  %v1127_v19 = vld [vmem:[#allocation8 + $0x18] sm:$0xff]   ;;  %v1131_v24 = vld [vmem:[#allocation8 + $0x20] sm:$0xff]   ;;  %v1134_v27 = vld [vmem:[#allocation8 + $0xe8] sm:$0xff]  }
  0x44   :  { %s819_s3 = scvt.s32.f32 %s818_s10  ;;  %s841_s11 = ssub.s32 %s1362_s1, %s1360_s8  ;;  %1012 = vmatpush3.bf16.msra.mxu0 %v1119_v9  ;;  %v1128_v21 = vld [vmem:[#allocation8 + $0x98] sm:$0xff]   ;;  %v1132_v25 = vld [vmem:[#allocation8 + $0xa0] sm:$0xff]   ;;  %v1135_v28 = vld [vmem:[#allocation8 + $0x28] sm:$0xff]  }
  0x45   :  { %v797_v3 = vstv %s796_s9  ;;  %s842_s12 = scvt.s32.f32 %s841_s11  ;;  %1034 = vmatpush3.bf16.msra.mxu1 %v1120_v10  ;;  %1013 = vmatprep.subr.bf16.mxu0 %v1121_v11  ;;  %v1136_v29 = vld [vmem:[#allocation8 + $0xa8] sm:$0xff]   ;;  %v1137_v30 = vld [vmem:[#allocation8 + $0x70] sm:$0xff]   ;;  %v1141_v34 = vld [vmem:[#allocation8 + $0x78] sm:$0xff]   ;;  %p1256_p13 = por %p1255_p12, %p1254_p11 }
  0x46   :  { %1177 = vrcp.f32 %v797_v3  ;;  %v820_v5 = vstv %s819_s3  ;;  %1035 = vmatprep.subr.bf16.mxu1 %v1122_v12  ;;  %v1138_v31 = vld [vmem:[#allocation8 + $0xf0] sm:$0xff]   ;;  %v1142_v35 = vld [vmem:[#allocation8 + $0xf8] sm:$0xff]   ;;  %v54_v38 = vld [vmem:[#allocation5] sm:$0xff] }
  0x47   :  { %1179 = vrcp.f32 %v820_v5  ;;  %v843_v7 = vstv %s842_s12  ;;  %v1139_v32 = vld [vmem:[#allocation8 + $0x30] sm:$0xff]   ;;  %v1143_v36 = vld [vmem:[#allocation8 + $0x38] sm:$0xff]   ;;  %v58_v39 = vld [vmem:[#allocation5 + $0x20] sm:$0xff]  ;;  %p1257_p0 = pnand %p1256_p13, %p1250_p10 }
  0x48   :  { %1181 = vrcp.f32 %v843_v7  ;;  %1014 = vmatpush3.bf16.msra.mxu0 %v1123_v13  ;;  %v1140_v33 = vld [vmem:[#allocation8 + $0xb0] sm:$0xff]   ;;  %v1144_v37 = vld [vmem:[#allocation8 + $0xb8] sm:$0xff]   ;;  %v55_v40 = vld [vmem:[#allocation5 + $0x8] sm:$0xff]  ;;  %v932_v41 = vcombine.low %v54_v38, %v58_v39  ;;  %v933_v42 = vcombine.high %v54_v38, %v58_v39  ;;  %v786_v39 = vlaneseq }
  0x49   :  { %1036 = vmatpush3.bf16.msra.mxu1 %v1124_v14  ;;  %1015 = vmatprep.subr.bf16.mxu0 %v1125_v15  ;;  %v59_v43 = vld [vmem:[#allocation5 + $0x28] sm:$0xff]  ;;  %v1145_v46 = vld [vmem:[#allocation8 + $0x140] sm:$0xff]   ;;  %v1153_v54 = vld [vmem:[#allocation8 + $0x150] sm:$0xff]  }
  0x4a   :  { %1037 = vmatprep.subr.bf16.mxu1 %v1126_v17  ;;  %v934_v44 = vcombine.low %v55_v40, %v59_v43  ;;  %v935_v45 = vcombine.high %v55_v40, %v59_v43  ;;  %653 = vmatprep.mubr.bf16.mxu0 %v933_v42  ;;  %v1146_v47 = vld [vmem:[#allocation8 + $0x1c0] sm:$0xff]   ;;  %v1149_v50 = vld [vmem:[#allocation8 + $0x148] sm:$0xff]   ;;  %v1154_v55 = vld [vmem:[#allocation8 + $0x1d0] sm:$0xff]   ;;  %v1376_v40 = vshrl.u32 %v786_v39, 7  ;;  %v793_v42 = vand.u32 127, %v786_v39 }
  0x4b   :  { %v1147_v48 = vld [vmem:[#allocation8 + $0x100] sm:$0xff]   ;;  %v1150_v51 = vld [vmem:[#allocation8 + $0x1c8] sm:$0xff]   ;;  %v1155_v56 = vld [vmem:[#allocation8 + $0x110] sm:$0xff]  }
  0x4c   :  { %1016 = vmatpush3.bf16.msra.mxu0 %v1127_v19  ;;  %694 = vmatprep.mubr.bf16.mxu1 %v935_v45  ;;  %v1148_v49 = vld [vmem:[#allocation8 + $0x180] sm:$0xff]   ;;  %v1151_v52 = vld [vmem:[#allocation8 + $0x108] sm:$0xff]   ;;  %v1156_v57 = vld [vmem:[#allocation8 + $0x190] sm:$0xff]   ;;  %vm802_vm0 = vcmp.gt.s32.totalorder %v1376_v40, 0  ;;  %v827_v45 = vstv %s1360_s8 }
  0x4d   :  { %1038 = vmatpush3.bf16.msra.mxu1 %v1128_v21  ;;  %1017 = vmatprep.subr.bf16.mxu0 %v1129_v22  ;;  %v1152_v53 = vld [vmem:[#allocation8 + $0x188] sm:$0xff]   ;;  %v1157_v58 = vld [vmem:[#allocation8 + $0x158] sm:$0xff]   ;;  %v1161_v62 = vld [vmem:[#allocation8 + $0x160] sm:$0xff]   ;;  %vm828_vm5 = vcmp.le.s32.totalorder %v1376_v40, %v827_v45  ;;  %vm848_vm13 = vcmp.gt.s32.totalorder %v1376_v40, %v827_v45 }
  0x4e   :  { %1039 = vmatprep.subr.bf16.mxu1 %v1130_v23  ;;  %v1158_v59 = vld [vmem:[#allocation8 + $0x1d8] sm:$0xff]   ;;  %v1162_v63 = vld [vmem:[#allocation8 + $0x1e0] sm:$0xff]   ;;  %v1165_v2 = vld [vmem:[#allocation8 + $0x168] sm:$0xff]  }
  0x4f   :  { %v1159_v60 = vld [vmem:[#allocation8 + $0x118] sm:$0xff]   ;;  %v1163_v0 = vld [vmem:[#allocation8 + $0x120] sm:$0xff]   ;;  %v1166_v3 = vld [vmem:[#allocation8 + $0x1e8] sm:$0xff]  }
  0x50   :  { %v1178_v16 = vpop.eup %1177  ;;  %1018 = vmatpush3.bf16.msra.mxu0 %v1131_v24  ;;  %v1160_v61 = vld [vmem:[#allocation8 + $0x198] sm:$0xff]   ;;  %v1164_v1 = vld [vmem:[#allocation8 + $0x1a0] sm:$0xff]   ;;  %v1167_v4 = vld [vmem:[#allocation8 + $0x128] sm:$0xff]  }
  0x51   :  { %v1180_v18 = vpop.eup %1179  ;;  %1097 = vpush %v1178_v16  ;;  %1040 = vmatpush3.bf16.msra.mxu1 %v1132_v25  ;;  %1019 = vmatprep.subr.bf16.mxu0 %v1133_v26  ;;  %v1168_v5 = vld [vmem:[#allocation8 + $0x1a8] sm:$0xff]   ;;  %v1169_v6 = vld [vmem:[#allocation8 + $0x170] sm:$0xff]   ;;  %v1173_v10 = vld [vmem:[#allocation8 + $0x178] sm:$0xff]  }
  0x52   :  { %v1182_v20 = vpop.eup %1181  ;;  %1099 = vpush %v1180_v18  ;;  %1041 = vmatprep.subr.bf16.mxu1 %v1134_v27  ;;  %v1170_v7 = vld [vmem:[#allocation8 + $0x1f0] sm:$0xff]   ;;  %v1174_v11 = vld [vmem:[#allocation8 + $0x1f8] sm:$0xff]   ;;  %v931_v24 = vld [vmem:[%s1467_s4] ss:$0 sm:$0xff]  ;;  %s795_s4 = sld [smem:[#allocation4]] }
  0x53   :  { %1101 = vpush %v1182_v20  ;;  %v1171_v8 = vld [vmem:[#allocation8 + $0x130] sm:$0xff]   ;;  %v1175_v12 = vld [vmem:[#allocation8 + $0x138] sm:$0xff]  }
  0x54   :  { %1020 = vmatpush3.bf16.msra.mxu0 %v1135_v28  ;;  %v1172_v9 = vld [vmem:[#allocation8 + $0x1b0] sm:$0xff]   ;;  %v1176_v13 = vld [vmem:[#allocation8 + $0x1b8] sm:$0xff]  }
  0x55   :  { %1042 = vmatpush3.bf16.msra.mxu1 %v1136_v29  ;;  %1021 = vmatprep.subr.bf16.mxu0 %v1137_v30  ;;  %v56_v14 = vld [vmem:[#allocation5 + $0x10] sm:$0xff]  ;;  %v57_v18 = vld [vmem:[#allocation5 + $0x18] sm:$0xff] }
  0x56   :  { %1043 = vmatprep.subr.bf16.mxu1 %v1138_v31  ;;  %v60_v15 = vld [vmem:[#allocation5 + $0x30] sm:$0xff]  ;;  %v61_v19 = vld [vmem:[#allocation5 + $0x38] sm:$0xff] }
  0x57   :  { %v936_v16 = vcombine.low %v56_v14, %v60_v15  ;;  %v937_v17 = vcombine.high %v56_v14, %v60_v15  ;;  %v938_v20 = vcombine.low %v57_v18, %v61_v19  ;;  %v939_v21 = vcombine.high %v57_v18, %v61_v19 }
  0x58   :  { %1022 = vmatpush3.bf16.msra.mxu0 %v1139_v32  ;;  %v800_v43 = vstv %s795_s4 }
  0x59   :  { %1044 = vmatpush3.bf16.msra.mxu1 %v1140_v33  ;;  %1023 = vmatprep.subr.bf16.mxu0 %v1141_v34  ;;  %vm1383_vm2 = vcmp.eq.s32.totalorder %v793_v42, %v800_v43 }
  0x5a   :  { %1045 = vmatprep.subr.bf16.mxu1 %v1142_v35 }
  0x5c   :  { %1024 = vmatpush3.bf16.msra.mxu0 %v1143_v36 }
  0x5d   :  { %1046 = vmatpush3.bf16.msra.mxu1 %v1144_v37  ;;  %1053 = vmatprep.subr.bf16.mxu0 %v1145_v46 }
  0x5e   :  { %1075 = vmatprep.subr.bf16.mxu1 %v1146_v47 }
  0x5f   :  { %654 = vmatmul.mubr.bf16.vlgmr.msra.gmra.mrb[0].mxu0 %v932_v41  ;;  %v804_v41 = vstv %s1358_s0 }
  0x60   :  { %695 = vmatmul.mubr.bf16.vlgmr.msra.gmra.mrb[0].mxu1 %v934_v44  ;;  %1054 = vmatpush3.bf16.msra.mxu0 %v1147_v48  ;;  %vm805_vm1 = vcmp.le.s32.totalorder %v1376_v40, %v804_v41  ;;  %v788_v44 = vadd.s32 8, %v1376_v40  ;;  %v823_v48 = vstv %s1005_s15  ;;  %vm825_vm4 = vcmp.gt.s32.totalorder %v1376_v40, %v804_v41 }
  0x61   :  { %1076 = vmatpush3.bf16.msra.mxu1 %v1148_v49  ;;  %1055 = vmatprep.subr.bf16.mxu0 %v1149_v50  ;;  %vm1387_vm3 = vmand %vm802_vm0, %vm805_vm1  ;;  %v850_v49 = vstv %s1362_s1  ;;  %vm1398_vm10 = vcmp.eq.s32.totalorder %v793_v42, %v823_v48 }
  0x62   :  { %1077 = vmatprep.subr.bf16.mxu1 %v1150_v51  ;;  %735 = vmatprep.mubr.bf16.mxu0 %v937_v17  ;;  %vm806_vm6 = vcmp.le.s32.totalorder %v788_v44, %v804_v41  ;;  %vm809_vm7 = vmand %vm1383_vm2, %vm1387_vm3  ;;  %vm826_vm8 = vcmp.gt.s32.totalorder %v788_v44, %v804_v41  ;;  %vm829_vm9 = vcmp.le.s32.totalorder %v788_v44, %v827_v45  ;;  %vm891_vm3 = vcmp.eq.s32.totalorder %v788_v44, 15 }
  0x63   :  { %776 = vmatprep.mubr.bf16.mxu1 %v939_v21  ;;  %vm1402_vm11 = vmand %vm825_vm4, %vm828_vm5  ;;  %vm851_vm14 = vcmp.le.s32.totalorder %v1376_v40, %v850_v49  ;;  %vm849_vm1 = vcmp.gt.s32.totalorder %v788_v44, %v827_v45  ;;  %vm852_vm4 = vcmp.le.s32.totalorder %v788_v44, %v850_v49  ;;  %v1287_v21 = vmov 0.0  }
  0x64   :  { %1056 = vmatpush3.bf16.msra.mxu0 %v1151_v52  ;;  %vm1408_vm12 = vmand %vm1383_vm2, %vm806_vm6 }
  0x65   :  { %1078 = vmatpush3.bf16.msra.mxu1 %v1152_v53  ;;  %1057 = vmatprep.subr.bf16.mxu0 %v1153_v54  ;;  %v846_v53 = vstv %s1007_s16  ;;  %vm1414_vm15 = vmand %vm826_vm8, %vm829_vm9 }
  0x66   :  { %1079 = vmatprep.subr.bf16.mxu1 %v1154_v55  ;;  %vm832_vm0 = vmand %vm1398_vm10, %vm1402_vm11  ;;  %vm1422_vm5 = vcmp.eq.s32.totalorder %v793_v42, %v846_v53 }
  0x67   :  { %vm853_vm6 = vmand %vm848_vm13, %vm851_vm14 }
  0x68   :  { %1058 = vmatpush3.bf16.msra.mxu0 %v1155_v56  ;;  %vm833_vm8 = vmand %vm1398_vm10, %vm1414_vm15  ;;  %vm908_vm10 = vcmp.eq.s32.totalorder %v1376_v40, 1 }
  0x69   :  { %1080 = vmatpush3.bf16.msra.mxu1 %v1156_v57  ;;  %1059 = vmatprep.subr.bf16.mxu0 %v1157_v58  ;;  %vm1435_vm9 = vmand %vm849_vm1, %vm852_vm4 }
  0x6a   :  { %1081 = vmatprep.subr.bf16.mxu1 %v1158_v59  ;;  %vm855_vm11 = vmand %vm1422_vm5, %vm853_vm6 }
  0x6b   :  { %vm856_vm2 = vmand %vm1422_vm5, %vm1435_vm9 }
  0x6c   :  { %1060 = vmatpush3.bf16.msra.mxu0 %v1159_v60 }
  0x6d   :  { %1082 = vmatpush3.bf16.msra.mxu1 %v1160_v61  ;;  %1061 = vmatprep.subr.bf16.mxu0 %v1161_v62 }
  0x6e   :  { %1083 = vmatprep.subr.bf16.mxu1 %v1162_v63 }
  0x70   :  { %1062 = vmatpush3.bf16.msra.mxu0 %v1163_v0 }
  0x71   :  { %1084 = vmatpush3.bf16.msra.mxu1 %v1164_v1  ;;  %1063 = vmatprep.subr.bf16.mxu0 %v1165_v2 }
  0x72   :  { %1085 = vmatprep.subr.bf16.mxu1 %v1166_v3 }
  0x74   :  { %1064 = vmatpush3.bf16.msra.mxu0 %v1167_v4 }
  0x75   :  { %1086 = vmatpush3.bf16.msra.mxu1 %v1168_v5  ;;  %1065 = vmatprep.subr.bf16.mxu0 %v1169_v6 }
  0x76   :  { %1087 = vmatprep.subr.bf16.mxu1 %v1170_v7 }
  0x78   :  { %1066 = vmatpush3.bf16.msra.mxu0 %v1171_v8 }
  0x79   :  { %1088 = vmatpush3.bf16.msra.mxu1 %v1172_v9  ;;  %1067 = vmatprep.subr.bf16.mxu0 %v1173_v10 }
  0x7a   :  { %1089 = vmatprep.subr.bf16.mxu1 %v1174_v11 }
  0x7c   :  { %1068 = vmatpush3.bf16.msra.mxu0 %v1175_v12 }
  0x7d   :  { %1090 = vmatpush3.bf16.msra.mxu1 %v1176_v13 }
  0x7f   :  { %736 = vmatmul.mubr.bf16.vlgmr.msra.gmra.mrb[4].mxu0 %v936_v16 }
  0x80   :  { %777 = vmatmul.mubr.bf16.vlgmr.msra.gmra.mrb[4].mxu1 %v938_v20 }
  0x82   :  { %s1098_s17 = spop %1097 }
  0x83   :  { %s1100_s18 = spop %1099  ;;  %v811_v55 = vstv %s1098_s17 }
  0x84   :  { %v834_v56 = vstv %s1100_s18  ;;  %s1102_s19 = spop %1101  ;;  %v812_v58 = vsel %vm809_vm7, %v811_v55, 0.0  ;;  %v813_v62 = vsel %vm1408_vm12, %v811_v55, 0.0  ;;  %vm905_vm7 = vcmp.eq.s32.totalorder %v1376_v40, 0 }
  0x85   :  { %v835_v59 = vsel %vm832_vm0, %v834_v56, 0.0  ;;  %v857_v61 = vstv %s1102_s19  ;;  %v836_v63 = vsel %vm833_vm8, %v834_v56, 0.0  ;;  %vm911_vm12 = vcmp.eq.s32.totalorder %v1376_v40, 2 }
  0x86   :  { %v837_v1 = vadd.f32 %v835_v59, %v812_v58  ;;  %v858_v4 = vsel %vm855_vm11, %v857_v61, 0.0  ;;  %v838_v7 = vadd.f32 %v836_v63, %v813_v62  ;;  %v859_v12 = vsel %vm856_vm2, %v857_v61, 0.0 }
  0x88   :  { %v860_v16 = vadd.f32 %v858_v4, %v837_v1  ;;  %v861_v20 = vadd.f32 %v859_v12, %v838_v7 }
 0x132   :  { %v1025_v22 = vpop.f32.mrb[0].mxu0 }
 0x133   :  { %v1047_v23 = vpop.f32.mrb[0].mxu1  ;;  %v1026_v25 = vpop.f32.mrb[1].mxu0 }
 0x134   :  { %v1027_v26 = vadd.f32 %v1026_v25, %v1025_v22  ;;  %v1048_v27 = vpop.f32.mrb[1].mxu1  ;;  %v1028_v28 = vpop.f32.mrb[2].mxu0  ;;  %v1008_v22 = vsel %vm891_vm3, 1.0, %v1287_v21 }
 0x135   :  { %v1049_v29 = vadd.f32 %v1048_v27, %v1047_v23  ;;  %v1050_v30 = vpop.f32.mrb[2].mxu1  ;;  %v1029_v31 = vpop.f32.mrb[3].mxu0 }
 0x136   :  { %v656_v32 = vadd.f32 %v1027_v26, %v931_v24  ;;  %v1030_v33 = vadd.f32 %v1029_v31, %v1028_v28  ;;  %v1051_v34 = vpop.f32.mrb[3].mxu1 }
 0x137   :  { %v1052_v35 = vadd.f32 %v1051_v34, %v1050_v30 }
 0x138   :  { %v1372_v36 = vadd.f32 %v1049_v29, %v656_v32  ;;  %v659_v37 = vadd.f32 %v1030_v33, %v931_v24 }
 0x13a   :  { %v1374_v38 = vadd.f32 %v1052_v35, %v659_v37 }
 0x152   :  { %v1069_v0 = vpop.f32.mrb[4].mxu0 }
 0x153   :  { %v1091_v2 = vpop.f32.mrb[4].mxu1  ;;  %v1070_v3 = vpop.f32.mrb[5].mxu0 }
 0x154   :  { %v1071_v5 = vadd.f32 %v1070_v3, %v1069_v0  ;;  %v1092_v6 = vpop.f32.mrb[5].mxu1  ;;  %v1072_v8 = vpop.f32.mrb[6].mxu0 }
 0x155   :  { %v1093_v9 = vadd.f32 %v1092_v6, %v1091_v2  ;;  %v1094_v10 = vpop.f32.mrb[6].mxu1  ;;  %v1073_v11 = vpop.f32.mrb[7].mxu0 }
 0x156   :  { %v738_v13 = vadd.f32 %v1071_v5, %v1372_v36  ;;  %v1074_v14 = vadd.f32 %v1073_v11, %v1072_v8  ;;  %v1095_v15 = vpop.f32.mrb[7].mxu1 }
 0x157   :  { %v1096_v17 = vadd.f32 %v1095_v15, %v1094_v10 }
 0x158   :  { %v779_v18 = vadd.f32 %v1093_v9, %v738_v13  ;;  %v741_v19 = vadd.f32 %v1074_v14, %v1374_v38 }
 0x15a   :  { %v782_v23 = vadd.f32 %v1096_v17, %v741_v19  ;;  %v868_v24 = vsub.f32 %v779_v18, %v860_v16  ;;  %v896_v25 = vmul.f32 0.0, %v779_v18 }
 0x15c   :  { %v883_v26 = vadd.f32 %v782_v23, %v779_v18  ;;  %v897_v27 = vmul.f32 %v1008_v22, %v782_v23  ;;  %v869_v28 = vsub.f32 %v782_v23, %v861_v20  ;;  %v872_v31 = vmul.f32 %v868_v24, %v868_v24 }
 0x15e   :  { %v884_v29 = vrot.slane %v883_v26, 4  ;;  %v898_v30 = vadd.f32 %v897_v27, %v896_v25  ;;  %v873_v32 = vmul.f32 %v869_v28, %v869_v28 }
 0x160   :  { %v885_v33 = vadd.f32 %v884_v29, %v883_v26  ;;  %v899_v34 = vrot.slane %v898_v30, 4  ;;  %v874_v35 = vadd.f32 %v873_v32, %v872_v31 }
 0x162   :  { %v886_v36 = vrot.slane %v885_v33, 2  ;;  %v875_v37 = vrot.slane %v874_v35, 4  ;;  %v900_v39 = vadd.f32 %v899_v34, %v898_v30 }
 0x164   :  { %v876_v38 = vadd.f32 %v875_v37, %v874_v35  ;;  %v887_v41 = vadd.f32 %v886_v36, %v885_v33  ;;  %v901_v42 = vrot.slane %v900_v39, 2 }
 0x166   :  { %v877_v43 = vrot.slane %v876_v38, 2  ;;  %v888_v44 = vrot.slane %v887_v41, 1  ;;  %v902_v45 = vadd.f32 %v901_v42, %v900_v39 }
 0x168   :  { %v878_v46 = vadd.f32 %v877_v43, %v876_v38  ;;  %v903_v47 = vrot.slane %v902_v45, 1  ;;  %v889_v49 = vadd.f32 %v888_v44, %v887_v41 }
 0x16a   :  { %v879_v48 = vrot.slane %v878_v46, 1  ;;  %v904_v51 = vadd.f32 %v903_v47, %v902_v45  ;;  %v909_v53 = vsel %vm908_vm10, %v889_v49, 0.0 }
 0x16c   :  { %v880_v50 = vadd.f32 %v879_v48, %v878_v46  ;;  %v912_v55 = vsel %vm911_vm12, %v904_v51, 0.0 }
 0x16e   :  { %v906_v52 = vsel %vm905_vm7, %v880_v50, 0.0 }
 0x16f   :  { %v910_v54 = vadd.f32 %v909_v53, %v906_v52 }
 0x171   :  { %v913_v56 = vadd.f32 %v912_v55, %v910_v54 }
 0x173   :  { %914 = vst [vmem:[#allocation10] sm:$0xff] %v913_v56 }
 0x174   :  { %1260 = shalt.err (!%p1257_p0)
}
 0x175   :  { %s1261_s25 = scalar_lea.hbm %s1468_s5, 128 }
 0x176   :  { %p1262_p1 = scmp.ne.s32.totalorder %s1468_s5, %s1261_s25  ;;  %p1265_p2 = scmp.lt.u32.totalorder %s1261_s25, %s1468_s5 }
 0x178   :  { %p1267_p3 = pnand %p1265_p2, %p1262_p1 }
 0x17a   :  { %1270 = shalt.err (!%p1267_p3)
}
 0x17b   :  { %924 = dma.vmem_to_hbm [thread:$0]  %s922_s21, 128, %s1468_s5, [#allocation7]  }
 0x17c   :  { %1277 = dma.done.wait [#allocation7], 128  }
 0x17d   :  { %1278 = vsyncadd [#allocation7], 4294967168 }
 0x17e   :  { %928 = vsyncpa [#allocation6], 1 }
 0x17f   :  { %929 = vsyncpa [#allocation9], 1 }
 0x180   :  { %930 = vsyncpa [#allocation7], 1 }

</bundles_post_ra>
